<compile_context>
chip_gen: v5e
topology: v5e:2x2
jax: 0.10.0
libtpu: 0.0.40
codegen_flags: <defaults>
</compile_context>

<pallas_src>
import functools

import jax
import jax.numpy as jnp
from jax import lax
from jax.experimental import pallas as pl
from jax.experimental.pallas import tpu as pltpu


def _layernorm(x, gamma, beta, eps=1e-5):
    mu = jnp.mean(x, axis=-1, keepdims=True)
    var = jnp.mean((x - mu) ** 2, axis=-1, keepdims=True)
    return (x - mu) * lax.rsqrt(var + eps) * gamma + beta


def lstm_recurrence_kernel(x_ref, w_ih_ref, w_hh_ref, b_ref, h_out_ref, *, seq_len):
    """Whole-sequence LSTM in one grid step.

    x_ref is time-major flattened: row t*B + b is timestep t of sequence b.
    Returns the last hidden state h_T of shape (B, H).
    """
    TB, _ = x_ref.shape
    B = TB // seq_len
    H4 = w_hh_ref.shape[1]
    H = H4 // 4

    # Hoisted input projection: one (T*B, I) x (I, 4H) MXU matmul + bias for the
    # whole sequence instead of T tiny per-step matmuls.
    xw = jnp.dot(x_ref[...], w_ih_ref[...],
                 preferred_element_type=jnp.float32) + b_ref[...]
    w_hh = w_hh_ref[...]

    h = jnp.zeros((B, H), jnp.float32)
    c = jnp.zeros((B, H), jnp.float32)

    # Fully-unrolled time loop (seq_len is small and static); h/c stay in vregs.
    # TODO(synk): for long sequences, tile time into T_BLK-sized grid steps
    # ("arbitrary" axis) and keep h/c in VMEM scratch across grid iterations.
    for t in range(seq_len):
        gates = xw[t * B:(t + 1) * B, :] + jnp.dot(
            h, w_hh, preferred_element_type=jnp.float32)        # (B, 4H)
        # Two full-vreg transcendentals instead of four masked sub-slices.
        sig = jax.nn.sigmoid(gates)
        th = jnp.tanh(gates)
        i_g = sig[:, 0 * H:1 * H]
        f_g = sig[:, 1 * H:2 * H]
        g_g = th[:, 2 * H:3 * H]
        o_g = sig[:, 3 * H:4 * H]
        c = f_g * c + i_g * g_g
        h = o_g * jnp.tanh(c)

    h_out_ref[...] = h.astype(h_out_ref.dtype)


def mlp_head_kernel(h_ref, ln1_g_ref, ln1_b_ref, w1_ref, b1_ref,
                    ln2_g_ref, ln2_b_ref, w2_ref, b2_ref, out_ref):
    h = _layernorm(h_ref[...], ln1_g_ref[...], ln1_b_ref[...])       # layer_norm1
    z = jnp.dot(h, w1_ref[...], preferred_element_type=jnp.float32) + b1_ref[...]
    z = _layernorm(z, ln2_g_ref[...], ln2_b_ref[...])                # fc LayerNorm
    z = jnp.maximum(z, 0.0)                                          # ReLU
    # Dropout -> identity at inference.
    y = jnp.dot(z, w2_ref[...], preferred_element_type=jnp.float32) + b2_ref[...]
    out_ref[...] = y.astype(out_ref.dtype)


def lstm_network_forward(x, params):
    B, T, I = x.shape
    H = params["w_hh"].shape[0]
    Hh = params["w1"].shape[1]

    # Time-major flatten outside the kernel (cheap XLA op) so the kernel needs
    # no in-kernel reshape/relayout: row t*B + b == x[b, t, :].
    x_tm = jnp.transpose(x, (1, 0, 2)).reshape(T * B, I)

    full = lambda shape: pl.BlockSpec(shape, lambda i: tuple(0 for _ in shape))

    # ---- Recurrent kernel: whole sequence in one grid step --------------------
    h_last = pl.pallas_call(
        functools.partial(lstm_recurrence_kernel, seq_len=T),
        out_shape=jax.ShapeDtypeStruct((B, H), jnp.float32),
        grid_spec=pltpu.PrefetchScalarGridSpec(
            num_scalar_prefetch=0,
            grid=(1,),
            in_specs=[
                full((T * B, I)),        # x, time-major flattened
                full((I, 4 * H)),        # W_ih^T
                full((H, 4 * H)),        # W_hh^T
                full((1, 4 * H)),        # b_ih + b_hh
            ],
            out_specs=full((B, H)),
        ),
        compiler_params=pltpu.CompilerParams(
            dimension_semantics=("arbitrary",),
        ),
    )(x_tm, params["w_ih"], params["w_hh"], params["b"])

    # ---- MLP head kernel (kept out of the recurrent call) ---------------------
    out = pl.pallas_call(
        mlp_head_kernel,
        out_shape=jax.ShapeDtypeStruct((B, 1), jnp.float32),
        grid_spec=pltpu.PrefetchScalarGridSpec(
            num_scalar_prefetch=0,
            grid=(1,),
            in_specs=[
                full((B, H)),                       # h_last
                full((1, H)), full((1, H)),         # layer_norm1 gamma / beta
                full((H, Hh)), full((1, Hh)),       # fc1 W^T / b
                full((1, Hh)), full((1, Hh)),       # fc LayerNorm gamma / beta
                full((Hh, 1)), full((1, 1)),        # fc2 W^T / b
            ],
            out_specs=full((B, 1)),
        ),
        compiler_params=pltpu.CompilerParams(
            dimension_semantics=("arbitrary",),
        ),
    )(h_last, params["ln1_g"], params["ln1_b"], params["w1"], params["b1"],
      params["ln2_g"], params["ln2_b"], params["w2"], params["b2"])

    return out


def init_params(key, input_size, hidden_size):
    H, I, Hh = hidden_size, input_size, hidden_size // 2
    ks = jax.random.split(key, 8)
    scale = 0.1
    return {
        # LSTM weights stored transposed: (in, 4H), gate order i|f|g|o.
        "w_ih": scale * jax.random.normal(ks[0], (I, 4 * H), jnp.float32),
        "w_hh": scale * jax.random.normal(ks[1], (H, 4 * H), jnp.float32),
        "b": scale * jax.random.normal(ks[2], (1, 4 * H), jnp.float32),  # b_ih + b_hh folded
        "ln1_g": jnp.ones((1, H), jnp.float32),
        "ln1_b": jnp.zeros((1, H), jnp.float32),
        "w1": scale * jax.random.normal(ks[3], (H, Hh), jnp.float32),
        "b1": scale * jax.random.normal(ks[4], (1, Hh), jnp.float32),
        "ln2_g": jnp.ones((1, Hh), jnp.float32),
        "ln2_b": jnp.zeros((1, Hh), jnp.float32),
        "w2": scale * jax.random.normal(ks[5], (Hh, 1), jnp.float32),
        "b2": scale * jax.random.normal(ks[6], (1, 1), jnp.float32),
    }


def reference_forward(x, params):
    """Pure-JAX reference of the same forward pass for a sanity check."""
    B, T, I = x.shape
    H = params["w_hh"].shape[0]
    h = jnp.zeros((B, H), jnp.float32)
    c = jnp.zeros((B, H), jnp.float32)
    for t in range(T):
        gates = x[:, t, :] @ params["w_ih"] + h @ params["w_hh"] + params["b"]
        i_g = jax.nn.sigmoid(gates[:, 0 * H:1 * H])
        f_g = jax.nn.sigmoid(gates[:, 1 * H:2 * H])
        g_g = jnp.tanh(gates[:, 2 * H:3 * H])
        o_g = jax.nn.sigmoid(gates[:, 3 * H:4 * H])
        c = f_g * c + i_g * g_g
        h = o_g * jnp.tanh(c)
    h = _layernorm(h, params["ln1_g"], params["ln1_b"])
    z = jnp.maximum(_layernorm(h @ params["w1"] + params["b1"],
                               params["ln2_g"], params["ln2_b"]), 0.0)
    return z @ params["w2"] + params["b2"]


if __name__ == "__main__":
    B, T, I, H = 2, 8, 16, 32   # batch, seq, input_size, hidden_size

    key = jax.random.PRNGKey(0)
    kx, kp = jax.random.split(key)
    x = jax.random.normal(kx, (B, T, I), jnp.float32)
    params = init_params(kp, I, H)

    out = lstm_network_forward(x, params)
    out = jax.block_until_ready(out)

    ref = reference_forward(x, params)
    assert out.shape == (B, 1)
    assert jnp.allclose(out, ref, atol=1e-4, rtol=1e-4), (out, ref)

    print("KERNEL_OK")
</pallas_src>

<mosaic_0001>
module attributes {stable_mosaic.version = 11 : i64} {
  func.func @lstm_recurrence_kernel(%arg0: i32, %arg1: memref<16x16xf32, #tpu.memory_space<vmem>>, %arg2: memref<16x128xf32, #tpu.memory_space<vmem>>, %arg3: memref<32x128xf32, #tpu.memory_space<vmem>>, %arg4: memref<1x128xf32, #tpu.memory_space<vmem>>, %arg5: memref<2x32xf32, #tpu.memory_space<vmem>>) attributes {dimension_semantics = [#tpu.dimension_semantics<arbitrary>], iteration_bounds = array<i64: 1>, scalar_prefetch = 0 : i64, scratch_operands = 0 : i64, tpu.core_type = #tpu.core_type<tc>, window_params = [{pipeline_mode = #tpu.pipeline_mode<synchronous>, transform_indices = @transform_0, window_bounds = array<i64: 16, 16>}, {pipeline_mode = #tpu.pipeline_mode<synchronous>, transform_indices = @transform_1, window_bounds = array<i64: 16, 128>}, {pipeline_mode = #tpu.pipeline_mode<synchronous>, transform_indices = @transform_2, window_bounds = array<i64: 32, 128>}, {pipeline_mode = #tpu.pipeline_mode<synchronous>, transform_indices = @transform_3, window_bounds = array<i64: 1, 128>}, {pipeline_mode = #tpu.pipeline_mode<synchronous>, transform_indices = @transform_4, window_bounds = array<i64: 2, 32>}]} {
    %c0 = arith.constant 0 : index
    %c0_0 = arith.constant 0 : index
    %0 = vector.load %arg1[%c0, %c0_0] : memref<16x16xf32, #tpu.memory_space<vmem>>, vector<16x16xf32>
    %c0_1 = arith.constant 0 : index
    %c0_2 = arith.constant 0 : index
    %1 = vector.load %arg2[%c0_1, %c0_2] : memref<16x128xf32, #tpu.memory_space<vmem>>, vector<16x128xf32>
    %cst = arith.constant dense<0.000000e+00> : vector<16x128xf32>
    %2 = tpu.matmul %0, %1, %cst {dimension_numbers = #tpu.dot_dimension_numbers<[1], [0], [0], [1], [0, 0, 1, 1], [], []>} : vector<16x16xf32>, vector<16x128xf32>, vector<16x128xf32> -> vector<16x128xf32>
    %c0_3 = arith.constant 0 : index
    %c0_4 = arith.constant 0 : index
    %3 = vector.load %arg4[%c0_3, %c0_4] : memref<1x128xf32, #tpu.memory_space<vmem>>, vector<1x128xf32>
    %4 = vector.broadcast %3 : vector<1x128xf32> to vector<16x128xf32>
    %5 = arith.addf %2, %4 : vector<16x128xf32>
    %c0_5 = arith.constant 0 : index
    %c0_6 = arith.constant 0 : index
    %6 = vector.load %arg3[%c0_5, %c0_6] : memref<32x128xf32, #tpu.memory_space<vmem>>, vector<32x128xf32>
    %cst_7 = arith.constant 0.000000e+00 : f32
    %7 = vector.broadcast %cst_7 : f32 to vector<2x32xf32>
    %cst_8 = arith.constant 0.000000e+00 : f32
    %8 = vector.broadcast %cst_8 : f32 to vector<2x32xf32>
    %9 = vector.extract_strided_slice %5 {offsets = [0, 0], sizes = [2, 128], strides = [1, 1]} : vector<16x128xf32> to vector<2x128xf32>
    %cst_9 = arith.constant dense<0.000000e+00> : vector<2x128xf32>
    %10 = tpu.matmul %7, %6, %cst_9 {dimension_numbers = #tpu.dot_dimension_numbers<[1], [0], [0], [1], [0, 0, 1, 1], [], []>} : vector<2x32xf32>, vector<32x128xf32>, vector<2x128xf32> -> vector<2x128xf32>
    %11 = arith.addf %9, %10 : vector<2x128xf32>
    %12 = arith.negf %11 : vector<2x128xf32>
    %13 = math.exp %12 : vector<2x128xf32>
    %cst_10 = arith.constant 1.000000e+00 : f32
    %14 = vector.broadcast %cst_10 : f32 to vector<2x128xf32>
    %15 = arith.addf %14, %13 : vector<2x128xf32>
    %16 = arith.divf %14, %15 : vector<2x128xf32>
    %17 = math.tanh %11 : vector<2x128xf32>
    %18 = vector.extract_strided_slice %16 {offsets = [0, 0], sizes = [2, 32], strides = [1, 1]} : vector<2x128xf32> to vector<2x32xf32>
    %19 = vector.extract_strided_slice %16 {offsets = [0, 32], sizes = [2, 32], strides = [1, 1]} : vector<2x128xf32> to vector<2x32xf32>
    %20 = vector.extract_strided_slice %17 {offsets = [0, 64], sizes = [2, 32], strides = [1, 1]} : vector<2x128xf32> to vector<2x32xf32>
    %21 = vector.extract_strided_slice %16 {offsets = [0, 96], sizes = [2, 32], strides = [1, 1]} : vector<2x128xf32> to vector<2x32xf32>
    %22 = arith.mulf %19, %8 : vector<2x32xf32>
    %23 = arith.mulf %18, %20 : vector<2x32xf32>
    %24 = arith.addf %22, %23 : vector<2x32xf32>
    %25 = math.tanh %24 : vector<2x32xf32>
    %26 = arith.mulf %21, %25 : vector<2x32xf32>
    %27 = vector.extract_strided_slice %5 {offsets = [2, 0], sizes = [2, 128], strides = [1, 1]} : vector<16x128xf32> to vector<2x128xf32>
    %cst_11 = arith.constant dense<0.000000e+00> : vector<2x128xf32>
    %28 = tpu.matmul %26, %6, %cst_11 {dimension_numbers = #tpu.dot_dimension_numbers<[1], [0], [0], [1], [0, 0, 1, 1], [], []>} : vector<2x32xf32>, vector<32x128xf32>, vector<2x128xf32> -> vector<2x128xf32>
    %29 = arith.addf %27, %28 : vector<2x128xf32>
    %30 = arith.negf %29 : vector<2x128xf32>
    %31 = math.exp %30 : vector<2x128xf32>
    %cst_12 = arith.constant 1.000000e+00 : f32
    %32 = vector.broadcast %cst_12 : f32 to vector<2x128xf32>
    %33 = arith.addf %32, %31 : vector<2x128xf32>
    %34 = arith.divf %32, %33 : vector<2x128xf32>
    %35 = math.tanh %29 : vector<2x128xf32>
    %36 = vector.extract_strided_slice %34 {offsets = [0, 0], sizes = [2, 32], strides = [1, 1]} : vector<2x128xf32> to vector<2x32xf32>
    %37 = vector.extract_strided_slice %34 {offsets = [0, 32], sizes = [2, 32], strides = [1, 1]} : vector<2x128xf32> to vector<2x32xf32>
    %38 = vector.extract_strided_slice %35 {offsets = [0, 64], sizes = [2, 32], strides = [1, 1]} : vector<2x128xf32> to vector<2x32xf32>
    %39 = vector.extract_strided_slice %34 {offsets = [0, 96], sizes = [2, 32], strides = [1, 1]} : vector<2x128xf32> to vector<2x32xf32>
    %40 = arith.mulf %37, %24 : vector<2x32xf32>
    %41 = arith.mulf %36, %38 : vector<2x32xf32>
    %42 = arith.addf %40, %41 : vector<2x32xf32>
    %43 = math.tanh %42 : vector<2x32xf32>
    %44 = arith.mulf %39, %43 : vector<2x32xf32>
    %45 = vector.extract_strided_slice %5 {offsets = [4, 0], sizes = [2, 128], strides = [1, 1]} : vector<16x128xf32> to vector<2x128xf32>
    %cst_13 = arith.constant dense<0.000000e+00> : vector<2x128xf32>
    %46 = tpu.matmul %44, %6, %cst_13 {dimension_numbers = #tpu.dot_dimension_numbers<[1], [0], [0], [1], [0, 0, 1, 1], [], []>} : vector<2x32xf32>, vector<32x128xf32>, vector<2x128xf32> -> vector<2x128xf32>
    %47 = arith.addf %45, %46 : vector<2x128xf32>
    %48 = arith.negf %47 : vector<2x128xf32>
    %49 = math.exp %48 : vector<2x128xf32>
    %cst_14 = arith.constant 1.000000e+00 : f32
    %50 = vector.broadcast %cst_14 : f32 to vector<2x128xf32>
    %51 = arith.addf %50, %49 : vector<2x128xf32>
    %52 = arith.divf %50, %51 : vector<2x128xf32>
    %53 = math.tanh %47 : vector<2x128xf32>
    %54 = vector.extract_strided_slice %52 {offsets = [0, 0], sizes = [2, 32], strides = [1, 1]} : vector<2x128xf32> to vector<2x32xf32>
    %55 = vector.extract_strided_slice %52 {offsets = [0, 32], sizes = [2, 32], strides = [1, 1]} : vector<2x128xf32> to vector<2x32xf32>
    %56 = vector.extract_strided_slice %53 {offsets = [0, 64], sizes = [2, 32], strides = [1, 1]} : vector<2x128xf32> to vector<2x32xf32>
    %57 = vector.extract_strided_slice %52 {offsets = [0, 96], sizes = [2, 32], strides = [1, 1]} : vector<2x128xf32> to vector<2x32xf32>
    %58 = arith.mulf %55, %42 : vector<2x32xf32>
    %59 = arith.mulf %54, %56 : vector<2x32xf32>
    %60 = arith.addf %58, %59 : vector<2x32xf32>
    %61 = math.tanh %60 : vector<2x32xf32>
    %62 = arith.mulf %57, %61 : vector<2x32xf32>
    %63 = vector.extract_strided_slice %5 {offsets = [6, 0], sizes = [2, 128], strides = [1, 1]} : vector<16x128xf32> to vector<2x128xf32>
    %cst_15 = arith.constant dense<0.000000e+00> : vector<2x128xf32>
    %64 = tpu.matmul %62, %6, %cst_15 {dimension_numbers = #tpu.dot_dimension_numbers<[1], [0], [0], [1], [0, 0, 1, 1], [], []>} : vector<2x32xf32>, vector<32x128xf32>, vector<2x128xf32> -> vector<2x128xf32>
    %65 = arith.addf %63, %64 : vector<2x128xf32>
    %66 = arith.negf %65 : vector<2x128xf32>
    %67 = math.exp %66 : vector<2x128xf32>
    %cst_16 = arith.constant 1.000000e+00 : f32
    %68 = vector.broadcast %cst_16 : f32 to vector<2x128xf32>
    %69 = arith.addf %68, %67 : vector<2x128xf32>
    %70 = arith.divf %68, %69 : vector<2x128xf32>
    %71 = math.tanh %65 : vector<2x128xf32>
    %72 = vector.extract_strided_slice %70 {offsets = [0, 0], sizes = [2, 32], strides = [1, 1]} : vector<2x128xf32> to vector<2x32xf32>
    %73 = vector.extract_strided_slice %70 {offsets = [0, 32], sizes = [2, 32], strides = [1, 1]} : vector<2x128xf32> to vector<2x32xf32>
    %74 = vector.extract_strided_slice %71 {offsets = [0, 64], sizes = [2, 32], strides = [1, 1]} : vector<2x128xf32> to vector<2x32xf32>
    %75 = vector.extract_strided_slice %70 {offsets = [0, 96], sizes = [2, 32], strides = [1, 1]} : vector<2x128xf32> to vector<2x32xf32>
    %76 = arith.mulf %73, %60 : vector<2x32xf32>
    %77 = arith.mulf %72, %74 : vector<2x32xf32>
    %78 = arith.addf %76, %77 : vector<2x32xf32>
    %79 = math.tanh %78 : vector<2x32xf32>
    %80 = arith.mulf %75, %79 : vector<2x32xf32>
    %81 = vector.extract_strided_slice %5 {offsets = [8, 0], sizes = [2, 128], strides = [1, 1]} : vector<16x128xf32> to vector<2x128xf32>
    %cst_17 = arith.constant dense<0.000000e+00> : vector<2x128xf32>
    %82 = tpu.matmul %80, %6, %cst_17 {dimension_numbers = #tpu.dot_dimension_numbers<[1], [0], [0], [1], [0, 0, 1, 1], [], []>} : vector<2x32xf32>, vector<32x128xf32>, vector<2x128xf32> -> vector<2x128xf32>
    %83 = arith.addf %81, %82 : vector<2x128xf32>
    %84 = arith.negf %83 : vector<2x128xf32>
    %85 = math.exp %84 : vector<2x128xf32>
    %cst_18 = arith.constant 1.000000e+00 : f32
    %86 = vector.broadcast %cst_18 : f32 to vector<2x128xf32>
    %87 = arith.addf %86, %85 : vector<2x128xf32>
    %88 = arith.divf %86, %87 : vector<2x128xf32>
    %89 = math.tanh %83 : vector<2x128xf32>
    %90 = vector.extract_strided_slice %88 {offsets = [0, 0], sizes = [2, 32], strides = [1, 1]} : vector<2x128xf32> to vector<2x32xf32>
    %91 = vector.extract_strided_slice %88 {offsets = [0, 32], sizes = [2, 32], strides = [1, 1]} : vector<2x128xf32> to vector<2x32xf32>
    %92 = vector.extract_strided_slice %89 {offsets = [0, 64], sizes = [2, 32], strides = [1, 1]} : vector<2x128xf32> to vector<2x32xf32>
    %93 = vector.extract_strided_slice %88 {offsets = [0, 96], sizes = [2, 32], strides = [1, 1]} : vector<2x128xf32> to vector<2x32xf32>
    %94 = arith.mulf %91, %78 : vector<2x32xf32>
    %95 = arith.mulf %90, %92 : vector<2x32xf32>
    %96 = arith.addf %94, %95 : vector<2x32xf32>
    %97 = math.tanh %96 : vector<2x32xf32>
    %98 = arith.mulf %93, %97 : vector<2x32xf32>
    %99 = vector.extract_strided_slice %5 {offsets = [10, 0], sizes = [2, 128], strides = [1, 1]} : vector<16x128xf32> to vector<2x128xf32>
    %cst_19 = arith.constant dense<0.000000e+00> : vector<2x128xf32>
    %100 = tpu.matmul %98, %6, %cst_19 {dimension_numbers = #tpu.dot_dimension_numbers<[1], [0], [0], [1], [0, 0, 1, 1], [], []>} : vector<2x32xf32>, vector<32x128xf32>, vector<2x128xf32> -> vector<2x128xf32>
    %101 = arith.addf %99, %100 : vector<2x128xf32>
    %102 = arith.negf %101 : vector<2x128xf32>
    %103 = math.exp %102 : vector<2x128xf32>
    %cst_20 = arith.constant 1.000000e+00 : f32
    %104 = vector.broadcast %cst_20 : f32 to vector<2x128xf32>
    %105 = arith.addf %104, %103 : vector<2x128xf32>
    %106 = arith.divf %104, %105 : vector<2x128xf32>
    %107 = math.tanh %101 : vector<2x128xf32>
    %108 = vector.extract_strided_slice %106 {offsets = [0, 0], sizes = [2, 32], strides = [1, 1]} : vector<2x128xf32> to vector<2x32xf32>
    %109 = vector.extract_strided_slice %106 {offsets = [0, 32], sizes = [2, 32], strides = [1, 1]} : vector<2x128xf32> to vector<2x32xf32>
    %110 = vector.extract_strided_slice %107 {offsets = [0, 64], sizes = [2, 32], strides = [1, 1]} : vector<2x128xf32> to vector<2x32xf32>
    %111 = vector.extract_strided_slice %106 {offsets = [0, 96], sizes = [2, 32], strides = [1, 1]} : vector<2x128xf32> to vector<2x32xf32>
    %112 = arith.mulf %109, %96 : vector<2x32xf32>
    %113 = arith.mulf %108, %110 : vector<2x32xf32>
    %114 = arith.addf %112, %113 : vector<2x32xf32>
    %115 = math.tanh %114 : vector<2x32xf32>
    %116 = arith.mulf %111, %115 : vector<2x32xf32>
    %117 = vector.extract_strided_slice %5 {offsets = [12, 0], sizes = [2, 128], strides = [1, 1]} : vector<16x128xf32> to vector<2x128xf32>
    %cst_21 = arith.constant dense<0.000000e+00> : vector<2x128xf32>
    %118 = tpu.matmul %116, %6, %cst_21 {dimension_numbers = #tpu.dot_dimension_numbers<[1], [0], [0], [1], [0, 0, 1, 1], [], []>} : vector<2x32xf32>, vector<32x128xf32>, vector<2x128xf32> -> vector<2x128xf32>
    %119 = arith.addf %117, %118 : vector<2x128xf32>
    %120 = arith.negf %119 : vector<2x128xf32>
    %121 = math.exp %120 : vector<2x128xf32>
    %cst_22 = arith.constant 1.000000e+00 : f32
    %122 = vector.broadcast %cst_22 : f32 to vector<2x128xf32>
    %123 = arith.addf %122, %121 : vector<2x128xf32>
    %124 = arith.divf %122, %123 : vector<2x128xf32>
    %125 = math.tanh %119 : vector<2x128xf32>
    %126 = vector.extract_strided_slice %124 {offsets = [0, 0], sizes = [2, 32], strides = [1, 1]} : vector<2x128xf32> to vector<2x32xf32>
    %127 = vector.extract_strided_slice %124 {offsets = [0, 32], sizes = [2, 32], strides = [1, 1]} : vector<2x128xf32> to vector<2x32xf32>
    %128 = vector.extract_strided_slice %125 {offsets = [0, 64], sizes = [2, 32], strides = [1, 1]} : vector<2x128xf32> to vector<2x32xf32>
    %129 = vector.extract_strided_slice %124 {offsets = [0, 96], sizes = [2, 32], strides = [1, 1]} : vector<2x128xf32> to vector<2x32xf32>
    %130 = arith.mulf %127, %114 : vector<2x32xf32>
    %131 = arith.mulf %126, %128 : vector<2x32xf32>
    %132 = arith.addf %130, %131 : vector<2x32xf32>
    %133 = math.tanh %132 : vector<2x32xf32>
    %134 = arith.mulf %129, %133 : vector<2x32xf32>
    %135 = vector.extract_strided_slice %5 {offsets = [14, 0], sizes = [2, 128], strides = [1, 1]} : vector<16x128xf32> to vector<2x128xf32>
    %cst_23 = arith.constant dense<0.000000e+00> : vector<2x128xf32>
    %136 = tpu.matmul %134, %6, %cst_23 {dimension_numbers = #tpu.dot_dimension_numbers<[1], [0], [0], [1], [0, 0, 1, 1], [], []>} : vector<2x32xf32>, vector<32x128xf32>, vector<2x128xf32> -> vector<2x128xf32>
    %137 = arith.addf %135, %136 : vector<2x128xf32>
    %138 = arith.negf %137 : vector<2x128xf32>
    %139 = math.exp %138 : vector<2x128xf32>
    %cst_24 = arith.constant 1.000000e+00 : f32
    %140 = vector.broadcast %cst_24 : f32 to vector<2x128xf32>
    %141 = arith.addf %140, %139 : vector<2x128xf32>
    %142 = arith.divf %140, %141 : vector<2x128xf32>
    %143 = math.tanh %137 : vector<2x128xf32>
    %144 = vector.extract_strided_slice %142 {offsets = [0, 0], sizes = [2, 32], strides = [1, 1]} : vector<2x128xf32> to vector<2x32xf32>
    %145 = vector.extract_strided_slice %142 {offsets = [0, 32], sizes = [2, 32], strides = [1, 1]} : vector<2x128xf32> to vector<2x32xf32>
    %146 = vector.extract_strided_slice %143 {offsets = [0, 64], sizes = [2, 32], strides = [1, 1]} : vector<2x128xf32> to vector<2x32xf32>
    %147 = vector.extract_strided_slice %142 {offsets = [0, 96], sizes = [2, 32], strides = [1, 1]} : vector<2x128xf32> to vector<2x32xf32>
    %148 = arith.mulf %145, %132 : vector<2x32xf32>
    %149 = arith.mulf %144, %146 : vector<2x32xf32>
    %150 = arith.addf %148, %149 : vector<2x32xf32>
    %151 = math.tanh %150 : vector<2x32xf32>
    %152 = arith.mulf %147, %151 : vector<2x32xf32>
    %c0_25 = arith.constant 0 : index
    %c0_26 = arith.constant 0 : index
    %153 = vector.load %arg5[%c0_25, %c0_26] : memref<2x32xf32, #tpu.memory_space<vmem>>, vector<2x32xf32>
    tpu.vector_store %arg5[%c0_25, %c0_26], %152 {strides = array<i32>} : memref<2x32xf32, #tpu.memory_space<vmem>>, vector<2x32xf32>,
    return
  }
  func.func @transform_0(%arg0: i32) -> (i32, i32) {
    %c0_i32 = arith.constant 0 : i32
    %c0_i32_0 = arith.constant 0 : i32
    %c0_i32_1 = arith.constant 0 : i32
    return %c0_i32, %c0_i32_0 : i32, i32
  }
  func.func @transform_1(%arg0: i32) -> (i32, i32) {
    %c0_i32 = arith.constant 0 : i32
    %c0_i32_0 = arith.constant 0 : i32
    %c0_i32_1 = arith.constant 0 : i32
    return %c0_i32, %c0_i32_0 : i32, i32
  }
  func.func @transform_2(%arg0: i32) -> (i32, i32) {
    %c0_i32 = arith.constant 0 : i32
    %c0_i32_0 = arith.constant 0 : i32
    %c0_i32_1 = arith.constant 0 : i32
    return %c0_i32, %c0_i32_0 : i32, i32
  }
  func.func @transform_3(%arg0: i32) -> (i32, i32) {
    %c0_i32 = arith.constant 0 : i32
    %c0_i32_0 = arith.constant 0 : i32
    %c0_i32_1 = arith.constant 0 : i32
    return %c0_i32, %c0_i32_0 : i32, i32
  }
  func.func @transform_4(%arg0: i32) -> (i32, i32) {
    %c0_i32 = arith.constant 0 : i32
    %c0_i32_0 = arith.constant 0 : i32
    %c0_i32_1 = arith.constant 0 : i32
    return %c0_i32, %c0_i32_0 : i32, i32
  }
}

</mosaic_0001>

<bundles_post_ra>
// kernel: tpu_custom_call.1
= control target key start
LH: loop header
LB: loop body
LE: loop exit
PB: predicated region body
PF: predicated region fallthrough
CT: control target
= control target key end

     0   :  { %9 = vsyncpa [#allocation3], 0  ;;  %s977_s0 = inlined_call_operand.hbm [shape: f32[16,16], index: 0, kind: input, shape index: {}]   ;;  %s978_s1 = inlined_call_operand.hbm [shape: f32[16,128], index: 1, kind: input, shape index: {}]   ;;  %s979_s2 = inlined_call_operand.hbm [shape: f32[32,128], index: 2, kind: input, shape index: {}]   ;;  %s980_s3 = inlined_call_operand.vmem [shape: f32[1,128], index: 3, kind: input, shape index: {}]   ;;  %s981_s4 = inlined_call_operand.hbm [shape: f32[2,32], index: 4, kind: output, shape index: {}]  }
   0x1   :  { %10 = vsyncpa [#allocation6], 0 }
   0x2   :  { %11 = vsyncpa [#allocation4], 0  ;;  %s29_s17 = sshll.u32 %s978_s1, 4  ;;  %s871_s18 = smov [#allocation5]   ;;  %s30_s17 = int_to_ptr.hbm [resolvable:$true] %s29_s17 }
   0x3   :  { %s31_s19 = sshll.u32 %s871_s18, 4  ;;  %s16_s22 = sshll.u32 %s977_s0, 4  ;;  %s32_s19 = int_to_ptr.vmem [resolvable:$true] %s31_s19  ;;  %s17_s22 = int_to_ptr.hbm [resolvable:$true] %s16_s22 }
   0x4   :  { %s872_s23 = smov 128   ;;  %s873_s24 = smov 8  }
   0x5   :  { %37 = dma.hbm_to_vmem [thread:$0]  %s30_s17, 256, %s32_s19, [#allocation6], %s872_s23, %s872_s23, %s873_s24  }
   0x6   :  { %s874_s25 = smov [#allocation2]   ;;  %s42_s29 = sshll.u32 %s979_s2, 4  ;;  %s43_s29 = int_to_ptr.hbm [resolvable:$true] %s42_s29 }
   0x7   :  { %s18_s26 = sshll.u32 %s874_s25, 4  ;;  %s875_s1 = smov [#allocation7]   ;;  %s19_s26 = int_to_ptr.vmem [resolvable:$true] %s18_s26 }
   0x8   :  { %24 = dma.hbm_to_vmem [thread:$0]  %s17_s22, 256, %s19_s26, [#allocation3], %s872_s23, %s872_s23, %s873_s24  }
   0x9   :  { %s44_s30 = sshll.u32 %s875_s1, 4  ;;  %s45_s30 = int_to_ptr.vmem [resolvable:$true] %s44_s30 }
   0xa   :  { %50 = dma.hbm_to_vmem [thread:$0]  %s43_s29, 512, %s45_s30, [#allocation6], %s872_s23, %s872_s23, %s873_s24  }
   0xb   :  { %865 = dma.done.wait [#allocation3], 256  }
   0xc   :  { %866 = vsyncadd [#allocation3], 4294967040 }
   0xd   :  { %867 = dma.done.wait [#allocation6], 768  }
   0xe   :  { %868 = vsyncadd [#allocation6], 4294966528  ;;  %v106_v0 = vld [vmem:[#allocation7 + $0x18] sm:$0xff]  ;;  %v105_v2 = vld [vmem:[#allocation7 + $0x10] sm:$0xff]  ;;  %vm73_vm0 = vcmask 130048   ;;  %v876_v7 = vmov 0.0  }
   0xf   :  { %v68_v1 = vld [vmem:[#allocation5 + $0x8] sm:$0xff]  ;;  %123 = vmatpush.msra.mxu1 %v106_v0  ;;  %v67_v3 = vld [vmem:[#allocation5] sm:$0xff]  ;;  %v65_v4 = vld [vmem:[#allocation2] sm:$0xff]  ;;  %186 = vmatpush.msra.mxu2 %v106_v0  ;;  %s877_s5 = smov 64   ;;  %vm107_vm5 = vcmask 261120   ;;  %s879_s6 = smov [#allocation8]  }
  0x10   :  { %94 = vmatpush.msra.mxu0 %v68_v1  ;;  %v104_v5 = vld [vmem:[#allocation7 + $0x8] sm:$0xff]  ;;  %256 = vmatpush.msra.mxu3 %v106_v0  ;;  %v103_v6 = vld [vmem:[#allocation7] sm:$0xff]  ;;  %s665_s7 = sshll.u32 %s879_s6, 4  ;;  %s667_s10 = sshll.u32 %s981_s4, 4  ;;  %s666_s7 = int_to_ptr.vmem [resolvable:$true] %s665_s7  ;;  %s668_s10 = int_to_ptr.hbm [resolvable:$true] %s667_s10 }
  0x11   :  { %124 = vmatpush.msra.mxu1 %v105_v2  ;;  %187 = vmatpush.msra.mxu2 %v105_v2  ;;  %v918_v8 = vld [vmem:[%s980_s3] ss:$0 sm:$0xff]  ;;  %s878_s3 = smov 32  }
  0x12   :  { %95 = vmatpush.msra.mxu0 %v67_v3  ;;  %257 = vmatpush.msra.mxu3 %v105_v2 }
  0x13   :  { %678 = vmatmul.msk.f32.vlgmr.msra.gmra.mxu0 %vm73_vm0, %v65_v4  ;;  %125 = vmatpush.msra.mxu1 %v104_v5 }
  0x14   :  { %188 = vmatpush.msra.mxu2 %v104_v5  ;;  %532 = vmatpush.msrb.mxu0 %v106_v0 }
  0x15   :  { %126 = vmatpush.msra.mxu1 %v103_v6  ;;  %258 = vmatpush.msra.mxu3 %v104_v5 }
  0x16   :  { %127 = vmatmul.f32.vlgmr.msra.gmra.mxu1 %v876_v7  ;;  %189 = vmatpush.msra.mxu2 %v103_v6 }
  0x17   :  { %259 = vmatpush.msra.mxu3 %v103_v6  ;;  %326 = vmatpush.msrb.mxu1 %v106_v0 }
  0x18   :  { %396 = vmatpush.msrb.mxu2 %v106_v0  ;;  %533 = vmatpush.msrb.mxu0 %v105_v2 }
  0x19   :  { %462 = vmatpush.msrb.mxu3 %v106_v0  ;;  %327 = vmatpush.msrb.mxu1 %v105_v2 }
  0x1a   :  { %397 = vmatpush.msrb.mxu2 %v105_v2  ;;  %534 = vmatpush.msrb.mxu0 %v104_v5 }
  0x1b   :  { %463 = vmatpush.msrb.mxu3 %v105_v2  ;;  %328 = vmatpush.msrb.mxu1 %v104_v5 }
  0x1c   :  { %398 = vmatpush.msrb.mxu2 %v104_v5  ;;  %535 = vmatpush.msrb.mxu0 %v103_v6 }
  0x1d   :  { %464 = vmatpush.msrb.mxu3 %v104_v5  ;;  %329 = vmatpush.msrb.mxu1 %v103_v6 }
  0x1e   :  { %399 = vmatpush.msrb.mxu2 %v103_v6 }
  0x1f   :  { %465 = vmatpush.msrb.mxu3 %v103_v6  ;;  %602 = vmatpush.msra.mxu1 %v106_v0 }
  0x21   :  { %603 = vmatpush.msra.mxu1 %v105_v2 }
  0x23   :  { %604 = vmatpush.msra.mxu1 %v104_v5 }
  0x25   :  { %605 = vmatpush.msra.mxu1 %v103_v6 }
  0x90   :  { %v97_v9 = vpop.f32.mrf.mxu0 }
  0x91   :  { %v921_v10 = vadd.f32 %v918_v8, %v97_v9 }
  0x93   :  { %v128_v11 = vpop.f32.mrf.mxu1 }
  0x94   :  { %v131_v12 = vadd.f32 %v128_v11, %v921_v10 }
  0x96   :  { %705 = vtanh.f32 %v131_v12  ;;  %v680_v14 = vmul.f32 -1.442695, %v131_v12 }
  0x98   :  { %707 = vpow2.f32 %v680_v14 }
  0x9c   :  { %v706_v13 = vpop.eup %705 }
  0x9d   :  { %154 = vrot.lane.b32.xlu0 %v706_v13, %s877_s5 }
  0x9e   :  { %v708_v15 = vpop.eup %707 }
  0x9f   :  { %v135_v16 = vadd.f32 1.0, %v708_v15 }
  0xa1   :  { %709 = vrcp.f32 %v135_v16  ;;  %v147_v22 = vand.u32 2147483648, %v135_v16  ;;  %vm141_vm2 = vweird.f32 %v135_v16  ;;  %v145_v23 = vand.u32 2147483647, %v135_v16 }
  0xa3   :  { %v148_v25 = vor.u32 1.1754944e-38, %v147_v22  ;;  %vm146_vm4 = vcmp.eq.f32.partialorder %v145_v23, 8.507059e+37 }
  0xa7   :  { %v710_v17 = vpop.eup %709 }
  0xa8   :  { %v137_v18 = vmul.f32 %v710_v17, %v135_v16  ;;  %vm142_vm1 = vweird.f32 %v710_v17 }
  0xa9   :  { %vm143_vm3 = vmor %vm141_vm2, %vm142_vm1 }
  0xaa   :  { %v138_v19 = vsub.f32 1.0, %v137_v18 }
  0xac   :  { %v139_v20 = vmul.f32 %v710_v17, %v138_v19 }
  0xae   :  { %v140_v21 = vadd.f32 %v710_v17, %v139_v20 }
  0xb0   :  { %v144_v24 = vsel %vm143_vm3, %v710_v17, %v140_v21 }
  0xb1   :  { %v149_v27 = vsel %vm146_vm4, %v148_v25, %v144_v24 }
  0xb2   :  { %v152_v29 = vmul.f32 0.0, %v149_v27 }
 0x10f   :  { %v155_v26 = vpop.permute.xlu0 %154 }
 0x110   :  { %v157_v28 = vmul.f32 %v155_v26, %v149_v27 }
 0x112   :  { %159 = vrot.lane.b32.xlu0 %v157_v28, %s878_s3 }
 0x184   :  { %v160_v30 = vpop.permute.xlu0 %159 }
 0x185   :  { %v162_v31 = vadd.f32 %v160_v30, %v152_v29 }
 0x187   :  { %711 = vtanh.f32 %v162_v31  ;;  %v219_v55 = vrot.slane %v162_v31, 6 }
 0x18d   :  { %v712_v32 = vpop.eup %711 }
 0x18e   :  { %165 = vrot.lane.b32.xlu1 %v712_v32, %s877_s5 }
 0x200   :  { %v166_v33 = vpop.permute.xlu1 %165 }
 0x201   :  { %v168_v34 = vmul.f32 %v166_v33, %v149_v27 }
 0x203   :  { %170 = vrot.lane.b32.xlu1 %v168_v34, %s878_s3 }
 0x275   :  { %v171_v35 = vpop.permute.xlu1 %170 }
 0x276   :  { %681 = vmatmul.msk.f32.vlgmr.msra.gmra.mxu2 %vm107_vm5, %v171_v35 }
 0x2f9   :  { %v191_v36 = vpop.f32.mrf.mxu2 }
 0x2fa   :  { %v195_v37 = vrot.slane %v191_v36, 6 }
 0x2fc   :  { %v197_v38 = vadd.f32 %v195_v37, %v921_v10 }
 0x2fe   :  { %713 = vtanh.f32 %v197_v38  ;;  %v682_v40 = vmul.f32 -1.442695, %v197_v38 }
 0x300   :  { %715 = vpow2.f32 %v682_v40 }
 0x304   :  { %v714_v39 = vpop.eup %713 }
 0x305   :  { %223 = vrot.lane.b32.xlu2 %v714_v39, %s877_s5 }
 0x306   :  { %v716_v41 = vpop.eup %715 }
 0x307   :  { %v201_v42 = vadd.f32 1.0, %v716_v41 }
 0x309   :  { %717 = vrcp.f32 %v201_v42  ;;  %v213_v48 = vand.u32 2147483648, %v201_v42  ;;  %vm207_vm7 = vweird.f32 %v201_v42  ;;  %v211_v49 = vand.u32 2147483647, %v201_v42 }
 0x30b   :  { %v214_v51 = vor.u32 1.1754944e-38, %v213_v48  ;;  %vm212_vm9 = vcmp.eq.f32.partialorder %v211_v49, 8.507059e+37 }
 0x30f   :  { %v718_v43 = vpop.eup %717 }
 0x310   :  { %v203_v44 = vmul.f32 %v718_v43, %v201_v42  ;;  %vm208_vm6 = vweird.f32 %v718_v43 }
 0x311   :  { %vm209_vm8 = vmor %vm207_vm7, %vm208_vm6 }
 0x312   :  { %v204_v45 = vsub.f32 1.0, %v203_v44 }
 0x314   :  { %v205_v46 = vmul.f32 %v718_v43, %v204_v45 }
 0x316   :  { %v206_v47 = vadd.f32 %v718_v43, %v205_v46 }
 0x318   :  { %v210_v50 = vsel %vm209_vm8, %v718_v43, %v206_v47 }
 0x319   :  { %v215_v53 = vsel %vm212_vm9, %v214_v51, %v210_v50 }
 0x31a   :  { %v221_v56 = vmul.f32 %v219_v55, %v215_v53 }
 0x35f   :  { %v224_v52 = vpop.permute.xlu2 %223 }
 0x360   :  { %v226_v54 = vmul.f32 %v224_v52, %v215_v53 }
 0x362   :  { %228 = vrot.lane.b32.xlu2 %v226_v54, %s878_s3 }
 0x3bc   :  { %v229_v57 = vpop.permute.xlu2 %228 }
 0x3bd   :  { %v231_v58 = vadd.f32 %v229_v57, %v221_v56  ;;  %v66_v56 = vld [vmem:[#allocation2 + $0x8] sm:$0xff] }
 0x3be   :  { %679 = vmatmul.msk.f32.gmra.mxu0 %vm73_vm0, %v66_v56 }
 0x3bf   :  { %719 = vtanh.f32 %v231_v58  ;;  %v289_v21 = vrot.slane %v231_v58, 6 }
 0x3c5   :  { %v720_v59 = vpop.eup %719 }
 0x3c6   :  { %234 = vrot.lane.b32.xlu0 %v720_v59, %s877_s5 }
 0x438   :  { %v235_v60 = vpop.permute.xlu0 %234 }
 0x439   :  { %v237_v61 = vmul.f32 %v235_v60, %v215_v53 }
 0x43b   :  { %v239_v62 = vrot.slane %v237_v61, 2  ;;  %v100_v58 = vpop.f32.mrf.mxu0 }
 0x43c   :  { %v949_v59 = vadd.f32 %v918_v8, %v100_v58 }
 0x43d   :  { %240 = vrot.lane.b32.xlu1 %v239_v62, %s878_s3 }
 0x4af   :  { %v241_v63 = vpop.permute.xlu1 %240 }
 0x4b0   :  { %683 = vmatmul.msk.f32.vlgmr.msra.gmra.mxu3 %vm107_vm5, %v241_v63 }
 0x533   :  { %v261_v0 = vpop.f32.mrf.mxu3 }
 0x534   :  { %v265_v1 = vrot.slane %v261_v0, 4 }
 0x536   :  { %v267_v2 = vadd.f32 %v265_v1, %v921_v10 }
 0x538   :  { %721 = vtanh.f32 %v267_v2  ;;  %v684_v4 = vmul.f32 -1.442695, %v267_v2 }
 0x53a   :  { %723 = vpow2.f32 %v684_v4 }
 0x53e   :  { %v722_v3 = vpop.eup %721 }
 0x53f   :  { %293 = vrot.lane.b32.xlu2 %v722_v3, %s877_s5 }
 0x540   :  { %v724_v5 = vpop.eup %723 }
 0x541   :  { %v271_v6 = vadd.f32 1.0, %v724_v5 }
 0x543   :  { %725 = vrcp.f32 %v271_v6  ;;  %v283_v14 = vand.u32 2147483648, %v271_v6  ;;  %vm277_vm11 = vweird.f32 %v271_v6  ;;  %v281_v15 = vand.u32 2147483647, %v271_v6 }
 0x545   :  { %v284_v17 = vor.u32 1.1754944e-38, %v283_v14  ;;  %vm282_vm13 = vcmp.eq.f32.partialorder %v281_v15, 8.507059e+37 }
 0x549   :  { %v726_v7 = vpop.eup %725 }
 0x54a   :  { %v273_v9 = vmul.f32 %v726_v7, %v271_v6  ;;  %vm278_vm10 = vweird.f32 %v726_v7 }
 0x54b   :  { %vm279_vm12 = vmor %vm277_vm11, %vm278_vm10 }
 0x54c   :  { %v274_v11 = vsub.f32 1.0, %v273_v9 }
 0x54e   :  { %v275_v12 = vmul.f32 %v726_v7, %v274_v11 }
 0x550   :  { %v276_v13 = vadd.f32 %v726_v7, %v275_v12 }
 0x552   :  { %v280_v16 = vsel %vm279_vm12, %v726_v7, %v276_v13 }
 0x553   :  { %v285_v19 = vsel %vm282_vm13, %v284_v17, %v280_v16 }
 0x554   :  { %v291_v22 = vmul.f32 %v289_v21, %v285_v19 }
 0x599   :  { %v294_v18 = vpop.permute.xlu2 %293 }
 0x59a   :  { %v296_v20 = vmul.f32 %v294_v18, %v285_v19 }
 0x59c   :  { %298 = vrot.lane.b32.xlu0 %v296_v20, %s878_s3 }
 0x60e   :  { %v299_v23 = vpop.permute.xlu0 %298 }
 0x60f   :  { %v301_v24 = vadd.f32 %v299_v23, %v291_v22 }
 0x611   :  { %727 = vtanh.f32 %v301_v24  ;;  %v359_v48 = vrot.slane %v301_v24, 6 }
 0x617   :  { %v728_v25 = vpop.eup %727 }
 0x618   :  { %304 = vrot.lane.b32.xlu1 %v728_v25, %s877_s5 }
 0x68a   :  { %v305_v26 = vpop.permute.xlu1 %304 }
 0x68b   :  { %v307_v27 = vmul.f32 %v305_v26, %v285_v19 }
 0x68d   :  { %v309_v28 = vrot.slane %v307_v27, 4 }
 0x68f   :  { %310 = vrot.lane.b32.xlu2 %v309_v28, %s878_s3 }
 0x6e9   :  { %v311_v29 = vpop.permute.xlu2 %310 }
 0x6ea   :  { %685 = vmatmul.msk.f32.vlgmr.msrb.gmra.mxu1 %vm107_vm5, %v311_v29 }
 0x767   :  { %v331_v30 = vpop.f32.mrf.mxu1 }
 0x768   :  { %v335_v31 = vrot.slane %v331_v30, 2 }
 0x76a   :  { %v337_v32 = vadd.f32 %v335_v31, %v921_v10 }
 0x76c   :  { %729 = vtanh.f32 %v337_v32  ;;  %v686_v34 = vmul.f32 -1.442695, %v337_v32 }
 0x76e   :  { %731 = vpow2.f32 %v686_v34 }
 0x772   :  { %v730_v33 = vpop.eup %729 }
 0x773   :  { %363 = vrot.lane.b32.xlu0 %v730_v33, %s877_s5 }
 0x774   :  { %v732_v35 = vpop.eup %731 }
 0x775   :  { %v341_v36 = vadd.f32 1.0, %v732_v35 }
 0x777   :  { %733 = vrcp.f32 %v341_v36  ;;  %v353_v42 = vand.u32 2147483648, %v341_v36  ;;  %vm347_vm15 = vweird.f32 %v341_v36  ;;  %v351_v43 = vand.u32 2147483647, %v341_v36 }
 0x779   :  { %v354_v44 = vor.u32 1.1754944e-38, %v353_v42  ;;  %vm352_vm2 = vcmp.eq.f32.partialorder %v351_v43, 8.507059e+37 }
 0x77d   :  { %v734_v37 = vpop.eup %733 }
 0x77e   :  { %v343_v38 = vmul.f32 %v734_v37, %v341_v36  ;;  %vm348_vm14 = vweird.f32 %v734_v37 }
 0x77f   :  { %vm349_vm1 = vmor %vm347_vm15, %vm348_vm14 }
 0x780   :  { %v344_v39 = vsub.f32 1.0, %v343_v38 }
 0x782   :  { %v345_v40 = vmul.f32 %v734_v37, %v344_v39 }
 0x784   :  { %v346_v41 = vadd.f32 %v734_v37, %v345_v40 }
 0x786   :  { %v350_v10 = vsel %vm349_vm1, %v734_v37, %v346_v41 }
 0x787   :  { %v355_v46 = vsel %vm352_vm2, %v354_v44, %v350_v10 }
 0x788   :  { %v361_v49 = vmul.f32 %v359_v48, %v355_v46 }
 0x7e5   :  { %v364_v45 = vpop.permute.xlu0 %363 }
 0x7e6   :  { %v366_v47 = vmul.f32 %v364_v45, %v355_v46 }
 0x7e8   :  { %368 = vrot.lane.b32.xlu1 %v366_v47, %s878_s3 }
 0x85a   :  { %v369_v50 = vpop.permute.xlu1 %368 }
 0x85b   :  { %v371_v51 = vadd.f32 %v369_v50, %v361_v49 }
 0x85d   :  { %735 = vtanh.f32 %v371_v51  ;;  %v426_v15 = vrot.slane %v371_v51, 6 }
 0x863   :  { %v736_v52 = vpop.eup %735 }
 0x864   :  { %374 = vrot.lane.b32.xlu2 %v736_v52, %s877_s5 }
 0x8be   :  { %v375_v53 = vpop.permute.xlu2 %374 }
 0x8bf   :  { %v377_v54 = vmul.f32 %v375_v53, %v355_v46 }
 0x8c1   :  { %v379_v55 = vrot.slane %v377_v54, 6 }
 0x8c3   :  { %380 = vrot.lane.b32.xlu0 %v379_v55, %s878_s3 }
 0x935   :  { %v381_v57 = vpop.permute.xlu0 %380 }
 0x936   :  { %687 = vmatmul.msk.f32.vlgmr.msrb.gmra.mxu2 %vm107_vm5, %v381_v57 }
 0x9b9   :  { %v401_v60 = vpop.f32.mrf.mxu2 }
 0x9ba   :  { %v404_v61 = vadd.f32 %v401_v60, %v949_v59 }
 0x9bc   :  { %737 = vtanh.f32 %v404_v61  ;;  %v688_v63 = vmul.f32 -1.442695, %v404_v61 }
 0x9be   :  { %739 = vpow2.f32 %v688_v63 }
 0x9c2   :  { %v738_v62 = vpop.eup %737 }
 0x9c3   :  { %430 = vrot.lane.b32.xlu1 %v738_v62, %s877_s5 }
 0x9c4   :  { %v740_v0 = vpop.eup %739 }
 0x9c5   :  { %v408_v1 = vadd.f32 1.0, %v740_v0 }
 0x9c7   :  { %741 = vrcp.f32 %v408_v1  ;;  %v420_v8 = vand.u32 2147483648, %v408_v1  ;;  %vm414_vm3 = vweird.f32 %v408_v1  ;;  %v418_v7 = vand.u32 2147483647, %v408_v1 }
 0x9c9   :  { %v421_v11 = vor.u32 1.1754944e-38, %v420_v8  ;;  %vm419_vm6 = vcmp.eq.f32.partialorder %v418_v7, 8.507059e+37 }
 0x9cd   :  { %v742_v2 = vpop.eup %741 }
 0x9ce   :  { %v410_v3 = vmul.f32 %v742_v2, %v408_v1  ;;  %vm415_vm0 = vweird.f32 %v742_v2 }
 0x9cf   :  { %vm416_vm4 = vmor %vm414_vm3, %vm415_vm0  ;;  %vm658_vm0 = vcmask 261126  }
 0x9d0   :  { %v411_v4 = vsub.f32 1.0, %v410_v3 }
 0x9d2   :  { %v412_v5 = vmul.f32 %v742_v2, %v411_v4 }
 0x9d4   :  { %v413_v6 = vadd.f32 %v742_v2, %v412_v5 }
 0x9d6   :  { %v417_v9 = vsel %vm416_vm4, %v742_v2, %v413_v6 }
 0x9d7   :  { %v422_v13 = vsel %vm419_vm6, %v421_v11, %v417_v9 }
 0x9d8   :  { %v428_v16 = vmul.f32 %v426_v15, %v422_v13 }
 0xa35   :  { %v431_v12 = vpop.permute.xlu1 %430 }
 0xa36   :  { %v433_v14 = vmul.f32 %v431_v12, %v422_v13 }
 0xa38   :  { %435 = vrot.lane.b32.xlu2 %v433_v14, %s878_s3 }
 0xa92   :  { %v436_v17 = vpop.permute.xlu2 %435 }
 0xa93   :  { %v438_v18 = vadd.f32 %v436_v17, %v428_v16 }
 0xa95   :  { %743 = vtanh.f32 %v438_v18  ;;  %v495_v42 = vrot.slane %v438_v18, 6 }
 0xa9b   :  { %v744_v19 = vpop.eup %743 }
 0xa9c   :  { %441 = vrot.lane.b32.xlu0 %v744_v19, %s877_s5 }
 0xb0e   :  { %v442_v20 = vpop.permute.xlu0 %441 }
 0xb0f   :  { %v444_v21 = vmul.f32 %v442_v20, %v422_v13 }
 0xb11   :  { %446 = vrot.lane.b32.xlu1 %v444_v21, %s878_s3 }
 0xb83   :  { %v447_v22 = vpop.permute.xlu1 %446 }
 0xb84   :  { %689 = vmatmul.msk.f32.vlgmr.msrb.gmra.mxu3 %vm107_vm5, %v447_v22 }
 0xc07   :  { %v467_v23 = vpop.f32.mrf.mxu3 }
 0xc08   :  { %v471_v24 = vrot.slane %v467_v23, 6 }
 0xc0a   :  { %v473_v25 = vadd.f32 %v471_v24, %v949_v59 }
 0xc0c   :  { %745 = vtanh.f32 %v473_v25  ;;  %v690_v27 = vmul.f32 -1.442695, %v473_v25 }
 0xc0e   :  { %747 = vpow2.f32 %v690_v27 }
 0xc12   :  { %v746_v26 = vpop.eup %745 }
 0xc13   :  { %499 = vrot.lane.b32.xlu2 %v746_v26, %s877_s5 }
 0xc14   :  { %v748_v28 = vpop.eup %747 }
 0xc15   :  { %v477_v29 = vadd.f32 1.0, %v748_v28 }
 0xc17   :  { %749 = vrcp.f32 %v477_v29  ;;  %v489_v35 = vand.u32 2147483648, %v477_v29  ;;  %vm483_vm8 = vweird.f32 %v477_v29  ;;  %v487_v36 = vand.u32 2147483647, %v477_v29 }
 0xc19   :  { %v490_v38 = vor.u32 1.1754944e-38, %v489_v35  ;;  %vm488_vm10 = vcmp.eq.f32.partialorder %v487_v36, 8.507059e+37 }
 0xc1d   :  { %v750_v30 = vpop.eup %749 }
 0xc1e   :  { %v479_v31 = vmul.f32 %v750_v30, %v477_v29  ;;  %vm484_vm7 = vweird.f32 %v750_v30 }
 0xc1f   :  { %vm485_vm9 = vmor %vm483_vm8, %vm484_vm7 }
 0xc20   :  { %v480_v32 = vsub.f32 1.0, %v479_v31 }
 0xc22   :  { %v481_v33 = vmul.f32 %v750_v30, %v480_v32 }
 0xc24   :  { %v482_v34 = vadd.f32 %v750_v30, %v481_v33 }
 0xc26   :  { %v486_v37 = vsel %vm485_vm9, %v750_v30, %v482_v34 }
 0xc27   :  { %v491_v40 = vsel %vm488_vm10, %v490_v38, %v486_v37 }
 0xc28   :  { %v497_v43 = vmul.f32 %v495_v42, %v491_v40 }
 0xc6d   :  { %v500_v39 = vpop.permute.xlu2 %499 }
 0xc6e   :  { %v502_v41 = vmul.f32 %v500_v39, %v491_v40 }
 0xc70   :  { %504 = vrot.lane.b32.xlu0 %v502_v41, %s878_s3 }
 0xce2   :  { %v505_v10 = vpop.permute.xlu0 %504 }
 0xce3   :  { %v507_v44 = vadd.f32 %v505_v10, %v497_v43 }
 0xce5   :  { %751 = vtanh.f32 %v507_v44  ;;  %v565_v6 = vrot.slane %v507_v44, 6 }
 0xceb   :  { %v752_v45 = vpop.eup %751 }
 0xcec   :  { %510 = vrot.lane.b32.xlu1 %v752_v45, %s877_s5 }
 0xd5e   :  { %v511_v46 = vpop.permute.xlu1 %510 }
 0xd5f   :  { %v513_v47 = vmul.f32 %v511_v46, %v491_v40 }
 0xd61   :  { %v515_v48 = vrot.slane %v513_v47, 2 }
 0xd63   :  { %516 = vrot.lane.b32.xlu2 %v515_v48, %s878_s3 }
 0xdbd   :  { %v517_v49 = vpop.permute.xlu2 %516 }
 0xdbe   :  { %691 = vmatmul.msk.f32.vlgmr.msrb.gmra.mxu0 %vm107_vm5, %v517_v49 }
 0xe3b   :  { %v537_v50 = vpop.f32.mrf.mxu0 }
 0xe3c   :  { %v541_v51 = vrot.slane %v537_v50, 4 }
 0xe3e   :  { %v543_v52 = vadd.f32 %v541_v51, %v949_v59 }
 0xe40   :  { %753 = vtanh.f32 %v543_v52  ;;  %v692_v54 = vmul.f32 -1.442695, %v543_v52 }
 0xe42   :  { %755 = vpow2.f32 %v692_v54 }
 0xe46   :  { %v754_v53 = vpop.eup %753 }
 0xe47   :  { %569 = vrot.lane.b32.xlu0 %v754_v53, %s877_s5 }
 0xe48   :  { %v756_v55 = vpop.eup %755 }
 0xe49   :  { %v547_v56 = vadd.f32 1.0, %v756_v55 }
 0xe4b   :  { %757 = vrcp.f32 %v547_v56  ;;  %v559_v63 = vand.u32 2147483648, %v547_v56  ;;  %vm553_vm12 = vweird.f32 %v547_v56  ;;  %v557_v0 = vand.u32 2147483647, %v547_v56 }
 0xe4d   :  { %v560_v2 = vor.u32 1.1754944e-38, %v559_v63  ;;  %vm558_vm14 = vcmp.eq.f32.partialorder %v557_v0, 8.507059e+37 }
 0xe51   :  { %v758_v57 = vpop.eup %757 }
 0xe52   :  { %v549_v58 = vmul.f32 %v758_v57, %v547_v56  ;;  %vm554_vm11 = vweird.f32 %v758_v57 }
 0xe53   :  { %vm555_vm13 = vmor %vm553_vm12, %vm554_vm11 }
 0xe54   :  { %v550_v60 = vsub.f32 1.0, %v549_v58 }
 0xe56   :  { %v551_v61 = vmul.f32 %v758_v57, %v550_v60 }
 0xe58   :  { %v552_v62 = vadd.f32 %v758_v57, %v551_v61 }
 0xe5a   :  { %v556_v1 = vsel %vm555_vm13, %v758_v57, %v552_v62 }
 0xe5b   :  { %v561_v4 = vsel %vm558_vm14, %v560_v2, %v556_v1 }
 0xe5c   :  { %v567_v8 = vmul.f32 %v565_v6, %v561_v4 }
 0xeb9   :  { %v570_v3 = vpop.permute.xlu0 %569 }
 0xeba   :  { %v572_v5 = vmul.f32 %v570_v3, %v561_v4 }
 0xebc   :  { %574 = vrot.lane.b32.xlu1 %v572_v5, %s878_s3 }
 0xf2e   :  { %v575_v7 = vpop.permute.xlu1 %574 }
 0xf2f   :  { %v577_v9 = vadd.f32 %v575_v7, %v567_v8 }
 0xf31   :  { %759 = vtanh.f32 %v577_v9  ;;  %v635_v34 = vrot.slane %v577_v9, 6 }
 0xf37   :  { %v760_v11 = vpop.eup %759 }
 0xf38   :  { %580 = vrot.lane.b32.xlu2 %v760_v11, %s877_s5 }
 0xf92   :  { %v581_v12 = vpop.permute.xlu2 %580 }
 0xf93   :  { %v583_v13 = vmul.f32 %v581_v12, %v561_v4 }
 0xf95   :  { %v585_v14 = vrot.slane %v583_v13, 4 }
 0xf97   :  { %586 = vrot.lane.b32.xlu0 %v585_v14, %s878_s3 }
0x1009   :  { %v587_v15 = vpop.permute.xlu0 %586 }
0x100a   :  { %693 = vmatmul.msk.f32.vlgmr.msra.gmra.mxu1 %vm107_vm5, %v587_v15 }
0x1087   :  { %v607_v16 = vpop.f32.mrf.mxu1 }
0x1088   :  { %v611_v17 = vrot.slane %v607_v16, 2 }
0x108a   :  { %v613_v18 = vadd.f32 %v611_v17, %v949_v59 }
0x108c   :  { %761 = vtanh.f32 %v613_v18  ;;  %v694_v20 = vmul.f32 -1.442695, %v613_v18 }
0x108e   :  { %763 = vpow2.f32 %v694_v20 }
0x1092   :  { %v762_v19 = vpop.eup %761 }
0x1093   :  { %639 = vrot.lane.b32.xlu1 %v762_v19, %s877_s5 }
0x1094   :  { %v764_v21 = vpop.eup %763 }
0x1095   :  { %v617_v22 = vadd.f32 1.0, %v764_v21 }
0x1097   :  { %765 = vrcp.f32 %v617_v22  ;;  %v629_v28 = vand.u32 2147483648, %v617_v22  ;;  %vm623_vm5 = vweird.f32 %v617_v22  ;;  %v627_v29 = vand.u32 2147483647, %v617_v22 }
0x1099   :  { %v630_v30 = vor.u32 1.1754944e-38, %v629_v28  ;;  %vm628_vm2 = vcmp.eq.f32.partialorder %v627_v29, 8.507059e+37 }
0x109d   :  { %v766_v23 = vpop.eup %765 }
0x109e   :  { %v619_v24 = vmul.f32 %v766_v23, %v617_v22  ;;  %vm624_vm15 = vweird.f32 %v766_v23 }
0x109f   :  { %vm625_vm1 = vmor %vm623_vm5, %vm624_vm15 }
0x10a0   :  { %v620_v25 = vsub.f32 1.0, %v619_v24 }
0x10a2   :  { %v621_v26 = vmul.f32 %v766_v23, %v620_v25 }
0x10a4   :  { %v622_v27 = vadd.f32 %v766_v23, %v621_v26 }
0x10a6   :  { %v626_v59 = vsel %vm625_vm1, %v766_v23, %v622_v27 }
0x10a7   :  { %v631_v32 = vsel %vm628_vm2, %v630_v30, %v626_v59 }
0x10a8   :  { %v637_v35 = vmul.f32 %v635_v34, %v631_v32 }
0x1105   :  { %v640_v31 = vpop.permute.xlu1 %639 }
0x1106   :  { %v642_v33 = vmul.f32 %v640_v31, %v631_v32 }
0x1108   :  { %644 = vrot.lane.b32.xlu2 %v642_v33, %s878_s3 }
0x1162   :  { %v645_v36 = vpop.permute.xlu2 %644 }
0x1163   :  { %v647_v37 = vadd.f32 %v645_v36, %v637_v35 }
0x1165   :  { %767 = vtanh.f32 %v647_v37 }
0x116b   :  { %v768_v38 = vpop.eup %767 }
0x116c   :  { %650 = vrot.lane.b32.xlu0 %v768_v38, %s877_s5 }
0x11de   :  { %v651_v39 = vpop.permute.xlu0 %650 }
0x11df   :  { %v653_v40 = vmul.f32 %v651_v39, %v631_v32 }
0x11e1   :  { %655 = vrot.lane.b32.xlu1 %v653_v40, %s878_s3 }
0x1253   :  { %v656_v41 = vpop.permute.xlu1 %655 }
0x1254   :  { %659 = vst.msk [vmem:[#allocation8 - $0x6] sm:$0xc0] %vm658_vm0, %v656_v41 }
0x1255   :  { %670 = dma.vmem_to_hbm [thread:$0]  %s666_s7, 32, %s668_s10, [#allocation4]  }
0x1256   :  { %869 = dma.done.wait [#allocation4], 32  }
0x1257   :  { %870 = vsyncadd [#allocation4], 4294967264 }
0x1258   :  { %675 = vsyncpa [#allocation3], 1 }
0x1259   :  { %676 = vsyncpa [#allocation6], 1 }
0x125a   :  { %677 = vsyncpa [#allocation4], 1 }

</bundles_post_ra>
